<compile_context>
chip_gen: v5e
topology: v5e:2x2
jax: 0.10.0
libtpu: 0.0.40
codegen_flags: <defaults>
</compile_context>

<pallas_src>
import math
import jax
import jax.numpy as jnp
from jax.experimental import pallas as pl
from jax.experimental.pallas import tpu as pltpu


# ---------------------------------------------------------------------------
# Fixed sinusoidal tables (identical math to PyTorch FixedEmbedding /
# PositionalEmbedding __init__).
# ---------------------------------------------------------------------------
def sinusoid_table(n: int, d_model: int) -> jnp.ndarray:
    assert d_model % 2 == 0, "d_model must be even (matches the PyTorch code)"
    pos = jnp.arange(n, dtype=jnp.float32)[:, None]
    div = jnp.exp(jnp.arange(0, d_model, 2, dtype=jnp.float32)
                  * -(math.log(10000.0) / d_model))
    ang = pos * div
    t = jnp.zeros((n, d_model), jnp.float32)
    t = t.at[:, 0::2].set(jnp.sin(ang))
    t = t.at[:, 1::2].set(jnp.cos(ang))
    return t


def _round_up(x: int, m: int) -> int:
    return (x + m - 1) // m * m


_HOUR, _WDAY, _DAY, _MONTH = 24, 7, 32, 13   # TemporalEmbedding vocab sizes (freq='h')


# ---------------------------------------------------------------------------
# Standalone FixedEmbedding.forward (optimized: big tile, padded grid,
# table resident in VMEM via constant block index).
# ---------------------------------------------------------------------------
def _gather_kernel(idx_ref, w_ref, o_ref):
    # idx_ref: (tile, 1) int32 ; w_ref: (c_in, d_model) f32 ; o_ref: (tile, d_model)
    idx = idx_ref[...]
    tile = idx.shape[0]
    c_in = w_ref.shape[0]
    iota = jax.lax.broadcasted_iota(jnp.int32, (tile, c_in), 1)
    onehot = (iota == idx).astype(jnp.float32)   # exact 0/1 gather on the MXU
    # Note: out-of-range / negative indices give an all-zero row (torch errors).
    o_ref[...] = jnp.dot(onehot, w_ref[...], preferred_element_type=jnp.float32)


def fixed_embedding(x: jnp.ndarray, w: jnp.ndarray, *, tile: int = 512) -> jnp.ndarray:
    """FixedEmbedding.forward: w[x].  x: (B, L) ints, w: (c_in, d_model) f32."""
    B, L = x.shape
    c_in, d_model = w.shape
    N = B * L
    # Big tiles amortize the ~0.35us/step grid overhead; clamp for tiny inputs.
    tile = max(8, min(tile, _round_up(N, 8)))
    N_pad = _round_up(N, tile)                   # pad + slice instead of asserting
    idx = x.reshape(N, 1).astype(jnp.int32)
    if N_pad != N:
        idx = jnp.pad(idx, ((0, N_pad - N), (0, 0)))
    out = pl.pallas_call(
        _gather_kernel,
        out_shape=jax.ShapeDtypeStruct((N_pad, d_model), jnp.float32),
        grid_spec=pltpu.PrefetchScalarGridSpec(
            num_scalar_prefetch=0,
            grid=(N_pad // tile,),
            in_specs=[
                pl.BlockSpec((tile, 1), lambda i: (i, 0)),
                # Constant block index: tiny table stays resident in VMEM.
                pl.BlockSpec((c_in, d_model), lambda i: (0, 0)),
            ],
            out_specs=pl.BlockSpec((tile, d_model), lambda i: (i, 0)),
        ),
        compiler_params=pltpu.CompilerParams(
            dimension_semantics=("parallel",),   # shardable over v7x's 2 TCs
        ),
    )(idx, w)
    return out[:N].reshape(B, L, d_model)


# ---------------------------------------------------------------------------
# Fused DataEmbedding kernel.
# ---------------------------------------------------------------------------
def _data_embedding_kernel(xcat_ref, idx_ref, wflat_ref, table_ref, o_ref):
    # xcat_ref:  (tile, 3*c_in) f32 : [x[l-1], x[l], x[l+1]]  (circular over L)
    # idx_ref:   (tile, 6)  int32   : absolute rows into the combined table
    #                                 [hour, weekday, day, month, position, bias]
    # wflat_ref: (3*c_in, d_model)  : flattened circular-conv weight (constant)
    # table_ref: (V, d_model)       : [hour|weekday|day|month|pe|conv-bias] rows
    # o_ref:     (tile, d_model)
    idx = idx_ref[...]
    tile, n_idx = idx.shape
    V = table_ref.shape[0]
    iota = jax.lax.broadcasted_iota(jnp.int32, (tile, V), 1)
    multihot = (iota == idx[:, 0:1]).astype(jnp.float32)
    for c in range(1, n_idx):                    # static, n_idx == 6
        multihot = multihot + (iota == idx[:, c:c + 1]).astype(jnp.float32)
    # One MXU matmul sums all embedding lookups + positional row + conv bias.
    emb = jnp.dot(multihot, table_ref[...], preferred_element_type=jnp.float32)
    conv = jnp.dot(xcat_ref[...], wflat_ref[...], preferred_element_type=jnp.float32)
    o_ref[...] = conv + emb


def data_embedding(x, x_mark, conv_w, conv_b, *, tile: int = 512):
    """Fused DataEmbedding.forward (embed='fixed', freq='h', dropout=0.0).

    x:      (B, L, c_in) float  -- raw series values
    x_mark: (B, L, 4) int       -- columns [month, day, weekday, hour]
    conv_w: (d_model, c_in, 3)  -- TokenEmbedding circular Conv1d weight
    conv_b: (d_model,)          -- Conv1d bias
    returns (B, L, d_model) float32
    """
    B, L, c_in = x.shape
    d_model = conv_w.shape[0]
    N = B * L

    # Combined lookup table: temporal fixed embeddings + positional rows + bias.
    table = jnp.concatenate([
        sinusoid_table(_HOUR, d_model),
        sinusoid_table(_WDAY, d_model),
        sinusoid_table(_DAY, d_model),
        sinusoid_table(_MONTH, d_model),
        sinusoid_table(L, d_model),                       # pe[:L]
        conv_b.astype(jnp.float32)[None, :],              # conv bias as one row
    ], axis=0)                                            # (77 + L, d_model)
    off_h = 0
    off_w = _HOUR
    off_d = off_w + _WDAY
    off_m = off_d + _DAY
    off_p = off_m + _MONTH
    off_b = off_p + L

    xm = x_mark.astype(jnp.int32)
    pos = jnp.broadcast_to(jnp.arange(L, dtype=jnp.int32)[None, :], (B, L))
    idx = jnp.stack([
        xm[..., 3] + off_h,                    # hour
        xm[..., 2] + off_w,                    # weekday
        xm[..., 1] + off_d,                    # day
        xm[..., 0] + off_m,                    # month
        pos + off_p,                           # position
        jnp.full((B, L), off_b, jnp.int32),    # conv bias row
    ], axis=-1).reshape(N, 6)

    # Circular conv(k=3) as one matmul on [x[l-1], x[l], x[l+1]].
    xcat = jnp.concatenate(
        [jnp.roll(x, 1, axis=1), x, jnp.roll(x, -1, axis=1)], axis=-1
    ).reshape(N, 3 * c_in).astype(jnp.float32)
    w_flat = jnp.concatenate(
        [conv_w[:, :, 0].T, conv_w[:, :, 1].T, conv_w[:, :, 2].T], axis=0
    ).astype(jnp.float32)                                 # (3*c_in, d_model)

    tile = max(8, min(tile, _round_up(N, 8)))
    N_pad = _round_up(N, tile)
    if N_pad != N:
        xcat = jnp.pad(xcat, ((0, N_pad - N), (0, 0)))
        idx = jnp.pad(idx, ((0, N_pad - N), (0, 0)))      # pad rows sliced off below

    V = table.shape[0]
    out = pl.pallas_call(
        _data_embedding_kernel,
        out_shape=jax.ShapeDtypeStruct((N_pad, d_model), jnp.float32),
        grid_spec=pltpu.PrefetchScalarGridSpec(
            num_scalar_prefetch=0,
            grid=(N_pad // tile,),
            in_specs=[
                pl.BlockSpec((tile, 3 * c_in), lambda i: (i, 0)),
                pl.BlockSpec((tile, 6), lambda i: (i, 0)),
                # Constant-index full blocks: stay resident in VMEM across steps.
                pl.BlockSpec((3 * c_in, d_model), lambda i: (0, 0)),
                pl.BlockSpec((V, d_model), lambda i: (0, 0)),
            ],
            out_specs=pl.BlockSpec((tile, d_model), lambda i: (i, 0)),
        ),
        compiler_params=pltpu.CompilerParams(
            dimension_semantics=("parallel",),
        ),
    )(xcat, idx, w_flat, table)
    # Dropout is the identity (InformerStack passes dropout=0.0).
    # TODO(synk): freq='t' minute embedding would add one table segment + idx column.
    return out[:N].reshape(B, L, d_model)


if __name__ == "__main__":
    key = jax.random.PRNGKey(0)
    # Small Informer-like shapes; d_model a multiple of 128 keeps stores lane-dense.
    B, L, enc_in, d_model = 2, 16, 7, 128
    k1, k2, k3, k4, k5 = jax.random.split(key, 5)

    # ---- standalone FixedEmbedding check (hour embedding, vocab=24) ----
    hour_idx = jax.random.randint(k1, (B, L), 0, _HOUR, dtype=jnp.int32)
    hour_tab = sinusoid_table(_HOUR, d_model)
    emb = jax.block_until_ready(fixed_embedding(hour_idx, hour_tab))
    assert emb.shape == (B, L, d_model)
    assert jnp.allclose(emb, hour_tab[hour_idx], atol=1e-5, rtol=1e-5)

    # ---- fused DataEmbedding (the enc_embedding of InformerStack) ----
    x = jax.random.normal(k2, (B, L, enc_in), dtype=jnp.float32)
    month = jax.random.randint(k3, (B, L, 1), 0, _MONTH)
    day = jax.random.randint(k4, (B, L, 1), 0, _DAY)
    wday = jax.random.randint(k5, (B, L, 1), 0, _WDAY)
    x_mark = jnp.concatenate(
        [month, day, wday, hour_idx[..., None]], axis=-1).astype(jnp.int32)

    fan_in = enc_in * 3
    conv_w = jax.random.normal(k1, (d_model, enc_in, 3),
                               dtype=jnp.float32) * math.sqrt(2.0 / fan_in)
    conv_b = jax.random.normal(k2, (d_model,), dtype=jnp.float32) * 0.02

    out = jax.block_until_ready(data_embedding(x, x_mark, conv_w, conv_b))

    # Pure-JAX reference: plain gathers + explicit circular conv.
    hp = jax.lax.Precision.HIGHEST
    conv_ref = (jnp.einsum('blc,dc->bld', jnp.roll(x, 1, axis=1), conv_w[:, :, 0], precision=hp)
                + jnp.einsum('blc,dc->bld', x, conv_w[:, :, 1], precision=hp)
                + jnp.einsum('blc,dc->bld', jnp.roll(x, -1, axis=1), conv_w[:, :, 2], precision=hp)
                + conv_b)
    temporal_ref = (sinusoid_table(_HOUR, d_model)[x_mark[..., 3]]
                    + sinusoid_table(_WDAY, d_model)[x_mark[..., 2]]
                    + sinusoid_table(_DAY, d_model)[x_mark[..., 1]]
                    + sinusoid_table(_MONTH, d_model)[x_mark[..., 0]])
    ref = conv_ref + temporal_ref + sinusoid_table(L, d_model)[None]

    assert out.shape == (B, L, d_model) and out.dtype == jnp.float32
    assert jnp.allclose(out, ref, atol=1e-4, rtol=1e-4), \
        float(jnp.max(jnp.abs(out - ref)))

    print("KERNEL_OK")
</pallas_src>

<mosaic_0001>
module attributes {stable_mosaic.version = 11 : i64} {
  func.func @_gather_kernel(%arg0: i32, %arg1: memref<32x1xi32, #tpu.memory_space<vmem>>, %arg2: memref<24x128xf32, #tpu.memory_space<vmem>>, %arg3: memref<32x128xf32, #tpu.memory_space<vmem>>) attributes {dimension_semantics = [#tpu.dimension_semantics<parallel>], iteration_bounds = array<i64: 1>, scalar_prefetch = 0 : i64, scratch_operands = 0 : i64, tpu.core_type = #tpu.core_type<tc>, window_params = [{transform_indices = @transform_0, window_bounds = array<i64: 32, 1>}, {pipeline_mode = #tpu.pipeline_mode<synchronous>, transform_indices = @transform_1, window_bounds = array<i64: 24, 128>}, {transform_indices = @transform_2, window_bounds = array<i64: 32, 128>}]} {
    %c0 = arith.constant 0 : index
    %c0_0 = arith.constant 0 : index
    %0 = vector.load %arg1[%c0, %c0_0] : memref<32x1xi32, #tpu.memory_space<vmem>>, vector<32x1xi32>
    %1 = tpu.iota {dimensions = array<i32: 1>} : vector<32x24xi32>
    %2 = vector.broadcast %0 : vector<32x1xi32> to vector<32x24xi32>
    %3 = arith.cmpi eq, %1, %2 : vector<32x24xi32>
    %4 = arith.extui %3 : vector<32x24xi1> to vector<32x24xi32>
    %5 = arith.sitofp %4 : vector<32x24xi32> to vector<32x24xf32>
    %c0_1 = arith.constant 0 : index
    %c0_2 = arith.constant 0 : index
    %6 = vector.load %arg2[%c0_1, %c0_2] : memref<24x128xf32, #tpu.memory_space<vmem>>, vector<24x128xf32>
    %cst = arith.constant dense<0.000000e+00> : vector<32x128xf32>
    %7 = tpu.matmul %5, %6, %cst {dimension_numbers = #tpu.dot_dimension_numbers<[1], [0], [0], [1], [0, 0, 1, 1], [], []>} : vector<32x24xf32>, vector<24x128xf32>, vector<32x128xf32> -> vector<32x128xf32>
    %c0_3 = arith.constant 0 : index
    %c0_4 = arith.constant 0 : index
    %8 = vector.load %arg3[%c0_3, %c0_4] : memref<32x128xf32, #tpu.memory_space<vmem>>, vector<32x128xf32>
    tpu.vector_store %arg3[%c0_3, %c0_4], %7 {strides = array<i32>} : memref<32x128xf32, #tpu.memory_space<vmem>>, vector<32x128xf32>,
    return
  }
  func.func @transform_0(%arg0: i32) -> (i32, i32) {
    %c0_i32 = arith.constant 0 : i32
    %c0_i32_0 = arith.constant 0 : i32
    return %arg0, %c0_i32 : i32, i32
  }
  func.func @transform_1(%arg0: i32) -> (i32, i32) {
    %c0_i32 = arith.constant 0 : i32
    %c0_i32_0 = arith.constant 0 : i32
    %c0_i32_1 = arith.constant 0 : i32
    return %c0_i32, %c0_i32_0 : i32, i32
  }
  func.func @transform_2(%arg0: i32) -> (i32, i32) {
    %c0_i32 = arith.constant 0 : i32
    %c0_i32_0 = arith.constant 0 : i32
    return %arg0, %c0_i32 : i32, i32
  }
}

</mosaic_0001>

<bundles_post_ra>
// kernel: tpu_custom_call.1
= control target key start
LH: loop header
LB: loop body
LE: loop exit
PB: predicated region body
PF: predicated region fallthrough
CT: control target
= control target key end

     0   :  { %v159_v2 = vmov 0   ;;  %s203_s0 = inlined_call_operand.vmem [shape: s32[32,1], index: 0, kind: input, shape index: {}]   ;;  %s204_s1 = inlined_call_operand.vmem [shape: f32[24,128], index: 1, kind: input, shape index: {}]   ;;  %s205_s2 = inlined_call_operand.hbm [shape: f32[32,128], index: 2, kind: output, shape index: {}]  }
   0x1   :  { %v14_v0 = vld [vmem:[%s203_s0 + $0x10] sm:$0xff]  ;;  %v12_v1 = vld [vmem:[%s203_s0] sm:$0xff]  ;;  %132 = vset.pattern.permute.xlu1 %v159_v2  ;;  %131 = vset.pattern.permute.xlu0 %v159_v2  ;;  %v43_v4 = vld [vmem:[%s204_s1 + $0x8] sm:$0xff] }
   0x2   :  { %v44_v3 = vld [vmem:[%s204_s1 + $0x10] sm:$0xff]  ;;  %25 = vperm.xlu0 %131, %v14_v0   ;;  %19 = vperm.xlu1 %132, %v12_v1  }
   0x3   :  { %7 = vsyncpa [#allocation3], 0  ;;  %118 = vmatpush.msra.mxu2 %v44_v3  ;;  %71 = vmatpush.msra.mxu0 %v44_v3  ;;  %v15_v5 = vld [vmem:[%s203_s0 + $0x18] sm:$0xff]  ;;  %v13_v6 = vld [vmem:[%s203_s0 + $0x8] sm:$0xff]  ;;  %v16_v8 = vlaneseq  ;;  %vm45_vm0 = vcmask 195584   ;;  %v160_v12 = vmov 0.0  }
   0x4   :  { %117 = vmatpush.msra.mxu1 %v44_v3  ;;  %119 = vmatpush.msra.mxu3 %v44_v3  ;;  %v42_v7 = vld [vmem:[%s204_s1] sm:$0xff]  ;;  %s161_s0 = smov [#allocation2]   ;;  %s97_s25 = sshll.u32 %s205_s2, 4  ;;  %s98_s25 = int_to_ptr.hbm [resolvable:$true] %s97_s25 }
   0x5   :  { %121 = vmatpush.msra.mxu2 %v43_v4  ;;  %72 = vmatpush.msra.mxu0 %v43_v4  ;;  %v17_v9 = vand.u32 127, %v16_v8  ;;  %s95_s1 = sshll.u32 %s161_s0, 4  ;;  %s162_s26 = smov 128   ;;  %s96_s1 = int_to_ptr.vmem [resolvable:$true] %s95_s1 }
   0x6   :  { %120 = vmatpush.msra.mxu1 %v43_v4  ;;  %122 = vmatpush.msra.mxu3 %v43_v4  ;;  %s163_s27 = smov 8  }
   0x7   :  { %124 = vmatpush.msra.mxu2 %v42_v7  ;;  %73 = vmatpush.msra.mxu0 %v42_v7 }
   0x8   :  { %123 = vmatpush.msra.mxu1 %v42_v7  ;;  %125 = vmatpush.msra.mxu3 %v42_v7 }
   0xa   :  { %28 = vperm.xlu0 %131, %v15_v5   ;;  %22 = vperm.xlu1 %132, %v13_v6  }
  0x74   :  { %v26_v10 = vpop.permute.xlu0 %25  ;;  %v20_v11 = vpop.permute.xlu1 %19 }
  0x75   :  { %vm32_vm1 = vcmp.eq.s32.totalorder %v17_v9, %v26_v10  ;;  %vm30_vm2 = vcmp.eq.s32.totalorder %v17_v9, %v20_v11 }
  0x76   :  { %v111_v13 = vsel %vm32_vm1, 1.0, %v160_v12  ;;  %v109_v14 = vsel %vm30_vm2, 1.0, %v160_v12 }
  0x77   :  { %115 = vmatmul.msk.f32.vlgmr.msra.gmra.mxu2 %vm45_vm0, %v111_v13  ;;  %113 = vmatmul.msk.f32.vlgmr.msra.gmra.mxu0 %vm45_vm0, %v109_v14 }
  0x7c   :  { %v29_v15 = vpop.permute.xlu0 %28  ;;  %v23_v16 = vpop.permute.xlu1 %22 }
  0x7d   :  { %vm33_vm3 = vcmp.eq.s32.totalorder %v17_v9, %v29_v15  ;;  %vm31_vm4 = vcmp.eq.s32.totalorder %v17_v9, %v23_v16 }
  0x7e   :  { %v112_v17 = vsel %vm33_vm3, 1.0, %v160_v12  ;;  %v110_v18 = vsel %vm31_vm4, 1.0, %v160_v12 }
  0x7f   :  { %114 = vmatmul.msk.f32.vlgmr.msra.gmra.mxu1 %vm45_vm0, %v110_v18  ;;  %116 = vmatmul.msk.f32.vlgmr.msra.gmra.mxu3 %vm45_vm0, %v112_v17 }
  0xf4   :  { %v75_v19 = vpop.f32.mrf.mxu0 }
  0xf5   :  { %87 = vst [vmem:[#allocation2] sm:$0xff] %v75_v19 }
  0xfa   :  { %v81_v20 = vpop.f32.mrf.mxu2 }
  0xfb   :  { %89 = vst [vmem:[#allocation2 + $0x10] sm:$0xff] %v81_v20 }
  0xfc   :  { %v78_v21 = vpop.f32.mrf.mxu1 }
  0xfd   :  { %88 = vst [vmem:[#allocation2 + $0x8] sm:$0xff] %v78_v21 }
 0x102   :  { %v84_v22 = vpop.f32.mrf.mxu3 }
 0x103   :  { %90 = vst [vmem:[#allocation2 + $0x18] sm:$0xff] %v84_v22 }
 0x104   :  { %103 = dma.vmem_to_hbm [thread:$0]  %s96_s1, 512, %s98_s25, [#allocation3], %s162_s26, %s162_s26, %s163_s27  }
 0x105   :  { %157 = dma.done.wait [#allocation3], 512  }
 0x106   :  { %158 = vsyncadd [#allocation3], 4294966784 }
 0x107   :  { %108 = vsyncpa [#allocation3], 1 }

</bundles_post_ra>
